<compile_context>
chip_gen: v6e
topology: v6e:2x2x1
jax: 0.10.0
libtpu: 0.0.40
codegen_flags: <defaults>
</compile_context>

<pallas_src>
import functools

import jax
import jax.numpy as jnp
from jax.experimental import pallas as pl
from jax.experimental.pallas import tpu as pltpu


NEG_SLOPE = 0.01  # PyTorch nn.LeakyReLU default negative_slope


def _leaky_relu(h):
    return jnp.where(h > 0, h, NEG_SLOPE * h)


def _round_up(n, m):
    return ((n + m - 1) // m) * m


def discriminator_kernel(x_ref, y_ref, w1x_ref, w1y_ref, b1_ref,
                         w2_ref, b2_ref, w3_ref, b3_ref, out_ref):
    # Layer 1: Linear(cat([x, y])) without materializing the concat:
    #   h1 = x @ W1x + y @ W1y + b1
    h1 = (jnp.dot(x_ref[...], w1x_ref[...], preferred_element_type=jnp.float32)
          + jnp.dot(y_ref[...], w1y_ref[...], preferred_element_type=jnp.float32)
          + b1_ref[...])
    h1 = _leaky_relu(h1)

    # Layer 2: Linear(latent_dim -> latent_dim2) + LeakyReLU
    h2 = jnp.dot(h1, w2_ref[...], preferred_element_type=jnp.float32) + b2_ref[...]
    h2 = _leaky_relu(h2)

    # Layer 3: Linear(latent_dim2 -> 1). N=1 -> use VPU multiply + lane reduction
    # instead of an MXU matmul with a single live output column. b3 is an SMEM scalar.
    out = jnp.sum(h2 * w3_ref[...], axis=-1, keepdims=True) + b3_ref[0, 0]
    out_ref[...] = out.astype(out_ref.dtype)


@functools.partial(jax.jit, static_argnames=("block_b",))
def discriminator_forward(x, y, params, *, block_b=512):
    """x: [B, Dx], y: [B, Dy]. Returns [B, 1] critic score."""
    w1x, w1y, b1, w2, b2, w3, b3 = params
    B, Dx = x.shape
    Dy = y.shape[1]
    L1 = w1x.shape[1]
    L2 = w2.shape[1]

    x = x.astype(jnp.float32)
    y = y.astype(jnp.float32)

    # Batch tile: multiple of 8 (sublane), pad B up so the tile divides it evenly.
    tb = min(block_b, _round_up(B, 8))
    bp = _round_up(B, tb)
    if bp != B:
        x = jnp.pad(x, ((0, bp - B), (0, 0)))
        y = jnp.pad(y, ((0, bp - B), (0, 0)))
    grid = (bp // tb,)

    def act_spec(d):
        return pl.BlockSpec((tb, d), lambda i: (i, 0))

    def resident(shape):
        # Full-array block, constant index map -> stays resident in VMEM across steps.
        return pl.BlockSpec(shape, lambda i: (0, 0))

    out = pl.pallas_call(
        discriminator_kernel,
        out_shape=jax.ShapeDtypeStruct((bp, 1), jnp.float32),
        grid=grid,
        in_specs=[
            act_spec(Dx),                                   # x tile
            act_spec(Dy),                                   # y tile
            resident((Dx, L1)),                             # W1x
            resident((Dy, L1)),                             # W1y
            resident((1, L1)),                              # b1
            resident((L1, L2)),                             # W2
            resident((1, L2)),                              # b2
            resident((1, L2)),                              # W3 (as a row)
            pl.BlockSpec((1, 1), lambda i: (0, 0),
                         memory_space=pltpu.MemorySpace.SMEM),  # b3 scalar
        ],
        out_specs=pl.BlockSpec((tb, 1), lambda i: (i, 0)),
        compiler_params=pltpu.CompilerParams(
            dimension_semantics=("parallel",)),
    )(x, y, w1x, w1y, b1, w2, b2, w3, b3)
    return out[:B]


def init_params(key, dim_x, dim_y, latent_dim, latent_dim2):
    """PyTorch-style uniform(+-1/sqrt(fan_in)) init.

    Stored pre-transposed as [in_features, out_features]; W1 is split into the x-
    and y- row blocks; W3 is stored as a [1, latent_dim2] row; b3 as a (1, 1) scalar.
    """
    input_dim = dim_x + dim_y

    def linear(k, fan_in, fan_out):
        kw, kb = jax.random.split(k)
        bound = 1.0 / jnp.sqrt(jnp.float32(fan_in))
        w = jax.random.uniform(kw, (fan_in, fan_out), jnp.float32, -bound, bound)
        b = jax.random.uniform(kb, (1, fan_out), jnp.float32, -bound, bound)
        return w, b

    k1, k2, k3 = jax.random.split(key, 3)
    w1, b1 = linear(k1, input_dim, latent_dim)
    w2, b2 = linear(k2, latent_dim, latent_dim2)
    w3, b3 = linear(k3, latent_dim2, 1)

    w1x, w1y = w1[:dim_x], w1[dim_x:]
    w3_row = w3.T                    # [1, latent_dim2]
    b3_s = b3.reshape(1, 1)
    return (w1x, w1y, b1, w2, b2, w3_row, b3_s)


def reference_forward(x, y, params):
    """Pure-JAX reference of the PyTorch forward pass (with concat + full W1)."""
    w1x, w1y, b1, w2, b2, w3_row, b3 = params
    w1 = jnp.concatenate([w1x, w1y], axis=0)
    out = jnp.concatenate([x, y], axis=1)
    out = _leaky_relu(out @ w1 + b1)
    out = _leaky_relu(out @ w2 + b2)
    return out @ w3_row.T + b3[0, 0]


if __name__ == "__main__":
    Dx, Dy = 16, 16                  # input_dim = Dx + Dy = 32
    latent_dim, latent_dim2 = 64, 32
    # (output_dim arg of the PyTorch __init__ is unused by the module itself.)

    key = jax.random.PRNGKey(0)
    kp, kx1, ky1, kx2, ky2 = jax.random.split(key, 5)
    params = init_params(kp, Dx, Dy, latent_dim, latent_dim2)

    # Small batch: single grid step.
    B = 8
    x = jax.random.normal(kx1, (B, Dx), jnp.float32)
    y = jax.random.normal(ky1, (B, Dy), jnp.float32)
    out = jax.block_until_ready(discriminator_forward(x, y, params))
    ref = reference_forward(x, y, params)
    assert out.shape == (B, 1), out.shape
    assert jnp.allclose(out, ref, atol=2e-3, rtol=2e-3), (out, ref)

    # Larger, ragged batch: exercises the batch grid + tail padding path.
    B2 = 300
    x2 = jax.random.normal(kx2, (B2, Dx), jnp.float32)
    y2 = jax.random.normal(ky2, (B2, Dy), jnp.float32)
    out2 = jax.block_until_ready(discriminator_forward(x2, y2, params, block_b=128))
    ref2 = reference_forward(x2, y2, params)
    assert out2.shape == (B2, 1), out2.shape
    assert jnp.allclose(out2, ref2, atol=2e-3, rtol=2e-3), (out2, ref2)

    print("KERNEL_OK")
</pallas_src>

<mosaic_0001>
module attributes {stable_mosaic.version = 11 : i64} {
  func.func @discriminator_kernel(%arg0: i32, %arg1: memref<8x16xf32, #tpu.memory_space<vmem>>, %arg2: memref<8x16xf32, #tpu.memory_space<vmem>>, %arg3: memref<16x64xf32, #tpu.memory_space<vmem>>, %arg4: memref<16x64xf32, #tpu.memory_space<vmem>>, %arg5: memref<1x64xf32, #tpu.memory_space<vmem>>, %arg6: memref<64x32xf32, #tpu.memory_space<vmem>>, %arg7: memref<1x32xf32, #tpu.memory_space<vmem>>, %arg8: memref<1x32xf32, #tpu.memory_space<vmem>>, %arg9: memref<1x1xf32, #tpu.memory_space<smem>>, %arg10: memref<8x1xf32, #tpu.memory_space<vmem>>) attributes {dimension_semantics = [#tpu.dimension_semantics<parallel>], iteration_bounds = array<i64: 1>, scalar_prefetch = 0 : i64, scratch_operands = 0 : i64, tpu.core_type = #tpu.core_type<tc>, window_params = [{transform_indices = @transform_0, window_bounds = array<i64: 8, 16>}, {transform_indices = @transform_1, window_bounds = array<i64: 8, 16>}, {pipeline_mode = #tpu.pipeline_mode<synchronous>, transform_indices = @transform_2, window_bounds = array<i64: 16, 64>}, {pipeline_mode = #tpu.pipeline_mode<synchronous>, transform_indices = @transform_3, window_bounds = array<i64: 16, 64>}, {pipeline_mode = #tpu.pipeline_mode<synchronous>, transform_indices = @transform_4, window_bounds = array<i64: 1, 64>}, {pipeline_mode = #tpu.pipeline_mode<synchronous>, transform_indices = @transform_5, window_bounds = array<i64: 64, 32>}, {pipeline_mode = #tpu.pipeline_mode<synchronous>, transform_indices = @transform_6, window_bounds = array<i64: 1, 32>}, {pipeline_mode = #tpu.pipeline_mode<synchronous>, transform_indices = @transform_7, window_bounds = array<i64: 1, 32>}, {transform_indices = @transform_8, window_bounds = array<i64: 1, 1>}, {transform_indices = @transform_9, window_bounds = array<i64: 8, 1>}]} {
    %c0 = arith.constant 0 : index
    %c0_0 = arith.constant 0 : index
    %0 = vector.load %arg1[%c0, %c0_0] : memref<8x16xf32, #tpu.memory_space<vmem>>, vector<8x16xf32>
    %c0_1 = arith.constant 0 : index
    %c0_2 = arith.constant 0 : index
    %1 = vector.load %arg3[%c0_1, %c0_2] : memref<16x64xf32, #tpu.memory_space<vmem>>, vector<16x64xf32>
    %cst = arith.constant dense<0.000000e+00> : vector<8x64xf32>
    %2 = tpu.matmul %0, %1, %cst {dimension_numbers = #tpu.dot_dimension_numbers<[1], [0], [0], [1], [0, 0, 1, 1], [], []>} : vector<8x16xf32>, vector<16x64xf32>, vector<8x64xf32> -> vector<8x64xf32>
    %c0_3 = arith.constant 0 : index
    %c0_4 = arith.constant 0 : index
    %3 = vector.load %arg2[%c0_3, %c0_4] : memref<8x16xf32, #tpu.memory_space<vmem>>, vector<8x16xf32>
    %c0_5 = arith.constant 0 : index
    %c0_6 = arith.constant 0 : index
    %4 = vector.load %arg4[%c0_5, %c0_6] : memref<16x64xf32, #tpu.memory_space<vmem>>, vector<16x64xf32>
    %cst_7 = arith.constant dense<0.000000e+00> : vector<8x64xf32>
    %5 = tpu.matmul %3, %4, %cst_7 {dimension_numbers = #tpu.dot_dimension_numbers<[1], [0], [0], [1], [0, 0, 1, 1], [], []>} : vector<8x16xf32>, vector<16x64xf32>, vector<8x64xf32> -> vector<8x64xf32>
    %6 = arith.addf %2, %5 : vector<8x64xf32>
    %c0_8 = arith.constant 0 : index
    %c0_9 = arith.constant 0 : index
    %7 = vector.load %arg5[%c0_8, %c0_9] : memref<1x64xf32, #tpu.memory_space<vmem>>, vector<1x64xf32>
    %8 = vector.broadcast %7 : vector<1x64xf32> to vector<8x64xf32>
    %9 = arith.addf %6, %8 : vector<8x64xf32>
    %cst_10 = arith.constant 0.000000e+00 : f32
    %10 = vector.broadcast %cst_10 : f32 to vector<8x64xf32>
    %11 = arith.cmpf ogt, %9, %10 : vector<8x64xf32>
    %cst_11 = arith.constant 0.00999999977 : f32
    %12 = vector.broadcast %cst_11 : f32 to vector<8x64xf32>
    %13 = arith.mulf %12, %9 : vector<8x64xf32>
    %14 = arith.select %11, %9, %13 : vector<8x64xi1>, vector<8x64xf32>
    %c0_12 = arith.constant 0 : index
    %c0_13 = arith.constant 0 : index
    %15 = vector.load %arg6[%c0_12, %c0_13] : memref<64x32xf32, #tpu.memory_space<vmem>>, vector<64x32xf32>
    %cst_14 = arith.constant dense<0.000000e+00> : vector<8x32xf32>
    %16 = tpu.matmul %14, %15, %cst_14 {dimension_numbers = #tpu.dot_dimension_numbers<[1], [0], [0], [1], [0, 0, 1, 1], [], []>} : vector<8x64xf32>, vector<64x32xf32>, vector<8x32xf32> -> vector<8x32xf32>
    %c0_15 = arith.constant 0 : index
    %c0_16 = arith.constant 0 : index
    %17 = vector.load %arg7[%c0_15, %c0_16] : memref<1x32xf32, #tpu.memory_space<vmem>>, vector<1x32xf32>
    %18 = vector.broadcast %17 : vector<1x32xf32> to vector<8x32xf32>
    %19 = arith.addf %16, %18 : vector<8x32xf32>
    %cst_17 = arith.constant 0.000000e+00 : f32
    %20 = vector.broadcast %cst_17 : f32 to vector<8x32xf32>
    %21 = arith.cmpf ogt, %19, %20 : vector<8x32xf32>
    %cst_18 = arith.constant 0.00999999977 : f32
    %22 = vector.broadcast %cst_18 : f32 to vector<8x32xf32>
    %23 = arith.mulf %22, %19 : vector<8x32xf32>
    %24 = arith.select %21, %19, %23 : vector<8x32xi1>, vector<8x32xf32>
    %c0_19 = arith.constant 0 : index
    %c0_20 = arith.constant 0 : index
    %25 = vector.load %arg8[%c0_19, %c0_20] : memref<1x32xf32, #tpu.memory_space<vmem>>, vector<1x32xf32>
    %26 = vector.broadcast %25 : vector<1x32xf32> to vector<8x32xf32>
    %27 = arith.mulf %24, %26 : vector<8x32xf32>
    %cst_21 = arith.constant dense<0.000000e+00> : vector<8xf32>
    %28 = vector.multi_reduction <add>, %27, %cst_21 [1] : vector<8x32xf32> to vector<8xf32>
    %29 = vector.shape_cast %28 : vector<8xf32> to vector<8x1xf32>
    %c0_22 = arith.constant 0 : index
    %c0_23 = arith.constant 0 : index
    %30 = memref.load %arg9[%c0_22, %c0_23] : memref<1x1xf32, #tpu.memory_space<smem>>
    %31 = vector.broadcast %30 : f32 to vector<8x1xf32>
    %32 = arith.addf %29, %31 : vector<8x1xf32>
    %c0_24 = arith.constant 0 : index
    %c0_25 = arith.constant 0 : index
    %33 = vector.load %arg10[%c0_24, %c0_25] : memref<8x1xf32, #tpu.memory_space<vmem>>, vector<8x1xf32>
    tpu.vector_store %arg10[%c0_24, %c0_25], %32 {strides = array<i32>} : memref<8x1xf32, #tpu.memory_space<vmem>>, vector<8x1xf32>,
    return
  }
  func.func @transform_0(%arg0: i32) -> (i32, i32) {
    %c0_i32 = arith.constant 0 : i32
    %c0_i32_0 = arith.constant 0 : i32
    return %arg0, %c0_i32 : i32, i32
  }
  func.func @transform_1(%arg0: i32) -> (i32, i32) {
    %c0_i32 = arith.constant 0 : i32
    %c0_i32_0 = arith.constant 0 : i32
    return %arg0, %c0_i32 : i32, i32
  }
  func.func @transform_2(%arg0: i32) -> (i32, i32) {
    %c0_i32 = arith.constant 0 : i32
    %c0_i32_0 = arith.constant 0 : i32
    %c0_i32_1 = arith.constant 0 : i32
    return %c0_i32, %c0_i32_0 : i32, i32
  }
  func.func @transform_3(%arg0: i32) -> (i32, i32) {
    %c0_i32 = arith.constant 0 : i32
    %c0_i32_0 = arith.constant 0 : i32
    %c0_i32_1 = arith.constant 0 : i32
    return %c0_i32, %c0_i32_0 : i32, i32
  }
  func.func @transform_4(%arg0: i32) -> (i32, i32) {
    %c0_i32 = arith.constant 0 : i32
    %c0_i32_0 = arith.constant 0 : i32
    %c0_i32_1 = arith.constant 0 : i32
    return %c0_i32, %c0_i32_0 : i32, i32
  }
  func.func @transform_5(%arg0: i32) -> (i32, i32) {
    %c0_i32 = arith.constant 0 : i32
    %c0_i32_0 = arith.constant 0 : i32
    %c0_i32_1 = arith.constant 0 : i32
    return %c0_i32, %c0_i32_0 : i32, i32
  }
  func.func @transform_6(%arg0: i32) -> (i32, i32) {
    %c0_i32 = arith.constant 0 : i32
    %c0_i32_0 = arith.constant 0 : i32
    %c0_i32_1 = arith.constant 0 : i32
    return %c0_i32, %c0_i32_0 : i32, i32
  }
  func.func @transform_7(%arg0: i32) -> (i32, i32) {
    %c0_i32 = arith.constant 0 : i32
    %c0_i32_0 = arith.constant 0 : i32
    %c0_i32_1 = arith.constant 0 : i32
    return %c0_i32, %c0_i32_0 : i32, i32
  }
  func.func @transform_8(%arg0: i32) -> (i32, i32) {
    %c0_i32 = arith.constant 0 : i32
    %c0_i32_0 = arith.constant 0 : i32
    %c0_i32_1 = arith.constant 0 : i32
    return %c0_i32, %c0_i32_0 : i32, i32
  }
  func.func @transform_9(%arg0: i32) -> (i32, i32) {
    %c0_i32 = arith.constant 0 : i32
    %c0_i32_0 = arith.constant 0 : i32
    return %arg0, %c0_i32 : i32, i32
  }
}

</mosaic_0001>

<bundles_post_ra>
// kernel: discriminator_forward.1
= control target key start
LH: loop header
LB: loop body
LE: loop exit
PB: predicated region body
PF: predicated region fallthrough
CT: control target
= control target key end

     0   :  { %v366_v0 = vmov 0.0   ;;  %vm367_vm0 = vmmov 0   ;;  %vm39_vm1 = vcmask 130048   ;;  %vm212_vm3 = vcmask 523264   ;;  %s480_s3 = inlined_call_operand.vmem [shape: f32[16,64], index: 3, kind: input, shape index: {}]   ;;  %s481_s1 = inlined_call_operand.vmem [shape: f32[8,16], index: 1, kind: input, shape index: {}]   ;;  %s482_s2 = inlined_call_operand.vmem [shape: f32[16,64], index: 2, kind: input, shape index: {}]   ;;  %s483_s5 = inlined_call_operand.vmem [shape: f32[64,32], index: 5, kind: input, shape index: {}]   ;;  %s484_s0 = inlined_call_operand.vmem [shape: f32[8,16], index: 0, kind: input, shape index: {}]   ;;  %s485_s4 = inlined_call_operand.vmem [shape: f32[1,64], index: 4, kind: input, shape index: {}]   ;;  %s486_s6 = inlined_call_operand.vmem [shape: f32[1,32], index: 6, kind: input, shape index: {}]   ;;  %s487_s7 = inlined_call_operand.vmem [shape: f32[1,32], index: 7, kind: input, shape index: {}]   ;;  %s488_s8 = inlined_call_operand.<no memory space> [shape: f32[1,1], index: 8, kind: input, shape index: {}]   ;;  %s489_s9 = inlined_call_operand.vmem [shape: f32[8,1], index: 9, kind: output, shape index: {}]  }
   0x1   :  { %331 = vmatprep.subr.mxu1 %v366_v0  ;;  %v38_v1 = vld [vmem:[%s480_s3 + $0x8] sm:$0xff]  ;;  %v37_v2 = vld [vmem:[%s480_s3] sm:$0xff]  ;;  %335 = vmatprep.mubr.msk.f32.mxu1 %vm367_vm0, %v366_v0  ;;  %v204_v5 = vld [vmem:[%s483_s5 + $0x38] sm:$0xff]  ;;  %vm297_vm5 = vcmask 261120   ;;  %v302_v33 = vstv %s488_s8  ;;  %vm304_vm6 = vcmask 7168  }
   0x2   :  { %332 = vmatpush3.msra.mxu1 %v38_v1  ;;  %v36_v3 = vld [vmem:[%s481_s1] sm:$0xff]  ;;  %345 = vmatprep.subr.mxu0 %v366_v0  ;;  %v35_v4 = vld [vmem:[%s482_s2 + $0x8] sm:$0xff]  ;;  %v203_v7 = vld [vmem:[%s483_s5 + $0x30] sm:$0xff] }
   0x3   :  { %333 = vmatprep.subr.mxu1 %v366_v0  ;;  %361 = vmatprep.mubr.msk.f32.mxu0 %vm367_vm0, %v366_v0  ;;  %v34_v6 = vld [vmem:[%s482_s2] sm:$0xff]  ;;  %v202_v9 = vld [vmem:[%s483_s5 + $0x28] sm:$0xff]  ;;  %v200_v11 = vld [vmem:[%s483_s5 + $0x18] sm:$0xff] }
   0x4   :  { %334 = vmatpush3.msra.mxu1 %v37_v2  ;;  %346 = vmatpush3.msra.mxu0 %v204_v5  ;;  %v33_v8 = vld [vmem:[%s484_s0] sm:$0xff]  ;;  %v199_v12 = vld [vmem:[%s483_s5 + $0x10] sm:$0xff]  ;;  %v198_v13 = vld [vmem:[%s483_s5 + $0x8] sm:$0xff] }
   0x5   :  { %336 = vmatmul.mubr.msk.f32.vlgmr.msra.gmra.mxu1 %vm39_vm1, %v36_v3  ;;  %338 = vmatprep.subr.mxu1 %v366_v0  ;;  %v201_v10 = vld [vmem:[%s483_s5 + $0x20] sm:$0xff] }
   0x6   :  { %339 = vmatpush3.msra.mxu1 %v35_v4  ;;  %342 = vmatprep.mubr.msk.f32.mxu1 %vm367_vm0, %v366_v0  ;;  %v197_v14 = vld [vmem:[%s483_s5] sm:$0xff] }
   0x7   :  { %340 = vmatprep.subr.mxu1 %v366_v0  ;;  %347 = vmatprep.subr.mxu0 %v366_v0  ;;  %v312_v18 = vld [vmem:[%s485_s4] ss:$0 sm:$0xff] }
   0x8   :  { %341 = vmatpush3.msra.mxu1 %v34_v6  ;;  %348 = vmatpush3.msra.mxu0 %v203_v7  ;;  %v313_v24 = vld [vmem:[%s486_s6] ss:$0 sm:$0xff] }
   0x9   :  { %343 = vmatmul.mubr.msk.f32.vlgmr.msra.gmra.mxu1 %vm39_vm1, %v33_v8  ;;  %349 = vmatprep.subr.mxu0 %v366_v0  ;;  %v315_v29 = vld [vmem:[%s487_s7] ss:$0 sm:$0xff] }
   0xa   :  { %350 = vmatpush3.msra.mxu0 %v202_v9 }
   0xb   :  { %351 = vmatprep.subr.mxu0 %v366_v0 }
   0xc   :  { %352 = vmatpush3.msra.mxu0 %v201_v10 }
   0xd   :  { %353 = vmatprep.subr.mxu0 %v366_v0 }
   0xe   :  { %354 = vmatpush3.msra.mxu0 %v200_v11 }
   0xf   :  { %355 = vmatprep.subr.mxu0 %v366_v0 }
  0x10   :  { %356 = vmatpush3.msra.mxu0 %v199_v12 }
  0x11   :  { %357 = vmatprep.subr.mxu0 %v366_v0 }
  0x12   :  { %358 = vmatpush3.msra.mxu0 %v198_v13 }
  0x13   :  { %359 = vmatprep.subr.mxu0 %v366_v0 }
  0x14   :  { %360 = vmatpush3.msra.mxu0 %v197_v14 }
  0xc5   :  { %v109_v15 = vpop.f32.mrf.mxu1 }
  0xc7   :  { %v337_v16 = vpop.f32.mrf.mxu1 }
  0xc9   :  { %v182_v17 = vpop.f32.mrf.mxu1 }
  0xca   :  { %v183_v19 = vadd.f32 %v182_v17, %v109_v15 }
  0xcb   :  { %v344_v20 = vpop.f32.mrf.mxu1 }
  0xcc   :  { %v193_v21 = vadd.f32 %v312_v18, %v183_v19 }
  0xce   :  { %v195_v22 = vmul.f32 0.01, %v193_v21  ;;  %vm194_vm2 = vcmp.gt.f32.partialorder %v193_v21, 0.0 }
  0xd0   :  { %v196_v23 = vsel %vm194_vm2, %v193_v21, %v195_v22 }
  0xd1   :  { %362 = vmatmul.mubr.msk.f32.vlgmr.msra.gmra.mxu0 %vm212_vm3, %v196_v23 }
 0x191   :  { %v282_v25 = vpop.f32.mrf.mxu0 }
 0x192   :  { %v283_v26 = vadd.f32 %v313_v24, %v282_v25 }
 0x193   :  { %v363_v27 = vpop.f32.mrf.mxu0 }
 0x194   :  { %v287_v28 = vmul.f32 0.01, %v283_v26  ;;  %vm286_vm4 = vcmp.gt.f32.partialorder %v283_v26, 0.0 }
 0x196   :  { %v288_v30 = vsel %vm286_vm4, %v283_v26, %v287_v28 }
 0x197   :  { %v296_v31 = vmul.f32 %v315_v29, %v288_v30 }
 0x199   :  { %v298_v32 = vsel %vm297_vm5, %v296_v31, 0.0 }
 0x19a   :  { %299 = vadd.xlane.f32.xlu0 %v298_v32 }
 0x223   :  { %v300_v34 = vpop.xlane.xlu0 %299 }
 0x224   :  { %v303_v35 = vadd.f32 %v302_v33, %v300_v34 }
 0x226   :  { %305 = vst.msk [vmem:[%s489_s9] sm:$0xff] %vm304_vm6, %v303_v35 }

</bundles_post_ra>
